<compile_context>
chip_gen: v6e
topology: v6e:2x2x1
jax: 0.10.0
libtpu: 0.0.40
codegen_flags: <defaults>
</compile_context>

<pallas_src>
import jax
import jax.numpy as jnp
from jax.experimental import pallas as pl
from jax.experimental.pallas import tpu as pltpu


# --------------------------------------------------------------------------
# Kernel
# --------------------------------------------------------------------------
def _make_prob_kernel(group):
    """Returns the kernel body; `group` is the sublane-group depth (1 or 8)."""

    def kernel(m_ref, p_ref, acc_ref):
        # m_ref: (tH, tT, tb) input tile; p_ref: (tH, tb) f32 output tile;
        # acc_ref: (tH, group, tb) or (tH, tb) f32 accumulator scratch.
        k = pl.program_id(2)

        @pl.when(k == 0)
        def _init():
            acc_ref[...] = jnp.zeros_like(acc_ref)

        m = m_ref[...].astype(jnp.float32)          # upcast (bf16 inputs)
        sq = m * m
        th, tt, tb = sq.shape
        if group > 1:
            # Sum 8-sublane groups: pure VPU vreg adds every step; the single
            # cross-sublane (XLU) fold happens once per output tile below.
            acc_ref[...] += jnp.sum(sq.reshape(th, tt // group, group, tb), axis=1)
        else:
            acc_ref[...] += jnp.sum(sq, axis=1)     # (th, tb)

        @pl.when(k == pl.num_programs(2) - 1)
        def _finish():
            if group > 1:
                p_ref[...] = jnp.sum(acc_ref[...], axis=1).astype(p_ref.dtype)
            else:
                p_ref[...] = acc_ref[...].astype(p_ref.dtype)

    return kernel


# --------------------------------------------------------------------------
# Tiling helpers
# --------------------------------------------------------------------------
def _pick_tile(total, target, quantum):
    """Largest divisor of `total` that is a multiple of `quantum` and <= target.
    Returns `total` itself when total <= target (full extent is always legal);
    returns None when no such divisor exists."""
    if total <= target:
        return total
    best = None
    d = quantum
    while d <= target:
        if total % d == 0:
            best = d
        d += quantum
    return best


def _vmem_capacity_bytes():
    """Physical VMEM of the attached TPU generation (conservative fallback)."""
    try:
        return int(pltpu.get_tpu_info().vmem_capacity_bytes)
    except Exception:
        return 64 * 1024 * 1024     # assume v7x-sized VMEM if the query fails


# --------------------------------------------------------------------------
# Forward pass
# --------------------------------------------------------------------------
def prob_forward(state, index, dim, N):
    """JAX/Pallas equivalent of prob(index, dim, N).forward(state).

    state: (dim**N, batch) real or complex array, each column one amplitude
      vector (float64 / complex128 are down-cast to 32-bit; TPU has no f64).
    returns: (batch, dim**len(index)) float32 probabilities.
    """
    dN, B = state.shape
    assert dN == dim ** N, (dN, dim, N)
    kept = sorted(index)                   # NewState sorts `index` in place
    assert len(kept) >= 1, "index must keep at least one qudit"
    da = dim ** len(kept)

    # ---- complex support: |amp|^2 = re^2 + im^2, so interleave re/im as two
    # adjacent "batch" columns and add them back after the kernel.
    if jnp.iscomplexobj(state):
        st = state.astype(jnp.complex64)
        x = jnp.stack([jnp.real(st), jnp.imag(st)], axis=-1).reshape(dN, 2 * B)
        b_eff = 2 * B
    else:
        x = state
        if x.dtype not in (jnp.float32, jnp.bfloat16):
            x = x.astype(jnp.float32)
        b_eff = B

    # ---- zero-copy layout: keep the ORIGINAL qudit order.  All axes after
    # the largest kept qudit are traced-out, so reshape (no HBM copy) to
    # (H, T, B) and reduce over T in the kernel; traced-out axes that sit
    # between kept qudits are folded afterwards on the tiny (H, B) result.
    K = kept[-1] + 1
    H = dim ** K
    T = dim ** (N - K)
    m = x.reshape(H, T, b_eff)
    itemsize = jnp.dtype(m.dtype).itemsize

    # ---- generation-aware VMEM budgets
    vmem_cap = _vmem_capacity_bytes()
    if vmem_cap >= 100 * 1024 * 1024:        # v5e / v6e: 128 MiB physical VMEM
        tile_budget = 12 * 1024 * 1024       # per pipelined input buffer
        vmem_limit = 96 * 1024 * 1024
    else:                                    # v7x: 64 MiB per TensorCore
        tile_budget = 6 * 1024 * 1024
        vmem_limit = 48 * 1024 * 1024

    # ---- batch tile (lanes): multiple of 128 or full extent
    if b_eff % 128 == 0 and b_eff > 256:
        tb = _pick_tile(b_eff, 512, 128)
    else:
        tb = b_eff

    # ---- H tile (output sublanes).  Ensure >= 2 'parallel' grid steps when
    # the batch axis has a single tile, so both v7x TensorCores get work
    # (no-op on single-TC v5e/v6e).
    th_target = 256
    if b_eff // tb == 1 and H >= 16:
        th_target = min(th_target, max(8, H // 2))
    th = _pick_tile(H, th_target, 8) or H

    # ---- T tile (reduction sublanes): dtype-aware quantum, budget-capped.
    q = {2: 16, 1: 32}.get(itemsize, 8)
    # Don't let the minimal (th, q, tb) tile overshoot the per-buffer budget
    # (the old max(8, ...) floor could silently exceed v7x's 64 MiB VMEM).
    while th * q * tb * itemsize > tile_budget and th > 8 and th % 16 == 0:
        th //= 2
    while th * q * tb * itemsize > tile_budget and tb > 128 and tb % 256 == 0:
        tb //= 2
    max_tt = max(q, (tile_budget // (th * tb * itemsize)) // q * q)
    tt = _pick_tile(T, max_tt, q)
    t_pad = T
    if tt is None:
        # No aligned divisor (e.g. qutrits with large T): zero-pad the
        # reduction axis once -- zeros add nothing to the sum of squares.
        tt = max_tt
        t_pad = int(pl.cdiv(T, tt)) * tt
        m = jnp.pad(m, ((0, 0), (0, t_pad - T), (0, 0)))

    # ---- 8-sublane-group accumulator unless the tile shape rules it out.
    group = 8 if (tt % 8 == 0 and th * 8 * tb * 4 <= 16 * 1024 * 1024) else 1
    acc_shape = (th, group, tb) if group > 1 else (th, tb)

    n_h, n_b, n_k = H // th, b_eff // tb, t_pad // tt

    in_map = lambda h, b, k: (h, k, b)
    if n_k >= 3:
        # Deeper input pipeline only pays off with several reduction steps.
        in_spec = pl.BlockSpec((th, tt, tb), in_map, pipeline_mode=pl.Buffered(3))
    else:
        in_spec = pl.BlockSpec((th, tt, tb), in_map)

    cost = pl.CostEstimate(
        flops=int(2 * H * t_pad * b_eff),
        transcendentals=0,
        bytes_accessed=int(H * t_pad * b_eff * itemsize + H * b_eff * 4),
    )

    partial = pl.pallas_call(
        _make_prob_kernel(group),
        out_shape=jax.ShapeDtypeStruct((H, b_eff), jnp.float32),
        grid_spec=pltpu.PrefetchScalarGridSpec(
            num_scalar_prefetch=0,
            grid=(n_h, n_b, n_k),                # reduction (T) axis last
            in_specs=[in_spec],
            out_specs=pl.BlockSpec((th, tb), lambda h, b, k: (h, b)),
            scratch_shapes=[pltpu.VMEM(acc_shape, jnp.float32)],
        ),
        compiler_params=pltpu.CompilerParams(
            dimension_semantics=("parallel", "parallel", "arbitrary"),
            vmem_limit_bytes=vmem_limit,
        ),
        cost_estimate=cost,
    )(m)

    # ---- fold traced-out qudits that sit between kept ones (tiny XLA op on
    # the (H, B) partials; identity when `kept` is a leading prefix).
    if H != da:
        comp_head = tuple(i for i in range(K) if i not in set(kept))
        partial = partial.reshape((dim,) * K + (b_eff,))
        partial = jnp.sum(partial, axis=comp_head).reshape(da, b_eff)
    if b_eff != B:
        partial = partial[:, 0::2] + partial[:, 1::2]     # re^2 + im^2

    # Exact normalization (no approximate reciprocal): probabilities sum to 1
    # to f32 accuracy.  All-zero columns give NaN, same as the PyTorch 0/0.
    probs = partial / jnp.sum(partial, axis=0, keepdims=True)
    return jnp.transpose(probs)                            # (batch, da)


# --------------------------------------------------------------------------
# Pure-JAX reference mirroring the PyTorch loop
# --------------------------------------------------------------------------
def _prob_reference(state, index, dim, N):
    kept = sorted(index)
    comp = [i for i in range(N) if i not in kept]
    da = dim ** len(kept)
    db = dim ** (N - len(kept))
    B = state.shape[1]
    out = []
    for i in range(B):
        s = state[:, i].reshape((dim,) * N)
        s = jnp.transpose(s, tuple(kept) + tuple(comp)).reshape(da, db)
        rho = jnp.matmul(s, jnp.conj(s).T, precision=jax.lax.Precision.HIGHEST)
        p = jnp.abs(jnp.diag(rho))
        out.append(p / jnp.sum(p))
    return jnp.stack(out)


# --------------------------------------------------------------------------
if __name__ == "__main__":
    key = jax.random.PRNGKey(0)
    k1, k2, k3, k4 = jax.random.split(key, 4)

    # Case 1: 6 qubits, keep [0, 2, 4] (non-prefix -> zero-copy (H,T,B) path
    # + XLA fold), real f32, batch 4.
    dim, N, index, B = 2, 6, [0, 2, 4], 4
    state = jax.random.normal(k1, (dim ** N, B), dtype=jnp.float32)
    out = jax.block_until_ready(prob_forward(state, index, dim, N))
    ref = _prob_reference(state, index, dim, N)
    assert out.shape == (B, dim ** len(index)), out.shape
    assert jnp.allclose(out, ref, rtol=1e-4, atol=1e-6), (out, ref)
    assert jnp.allclose(jnp.sum(out, axis=-1), jnp.ones((B,)), atol=1e-5)

    # Case 2: prefix subsystem [0, 1] (H == da, no fold; exercises the
    # 8-sublane-group accumulator path), 5 qubits, batch 8.
    dim, N, index, B = 2, 5, [0, 1], 8
    state = jax.random.normal(k2, (dim ** N, B), dtype=jnp.float32)
    out = jax.block_until_ready(prob_forward(state, index, dim, N))
    ref = _prob_reference(state, index, dim, N)
    assert out.shape == (B, dim ** len(index)), out.shape
    assert jnp.allclose(out, ref, rtol=1e-4, atol=1e-6), (out, ref)

    # Case 3: qutrits (dim=3) with complex amplitudes, keep [1, 2], batch 4.
    dim, N, index, B = 3, 4, [1, 2], 4
    re = jax.random.normal(k3, (dim ** N, B), dtype=jnp.float32)
    im = jax.random.normal(k4, (dim ** N, B), dtype=jnp.float32)
    state = (re + 1j * im).astype(jnp.complex64)
    out = jax.block_until_ready(prob_forward(state, index, dim, N))
    ref = _prob_reference(state, index, dim, N)
    assert out.shape == (B, dim ** len(index)), out.shape
    assert jnp.allclose(out, ref, rtol=1e-4, atol=1e-5), (out, ref)
    assert jnp.allclose(jnp.sum(out, axis=-1), jnp.ones((B,)), atol=1e-4)

    print("KERNEL_OK")
</pallas_src>

<mosaic_0001>
module attributes {stable_mosaic.version = 11 : i64} {
  func.func @kernel(%arg0: i32, %arg1: i32, %arg2: i32, %arg3: memref<16x2x4xf32, #tpu.memory_space<vmem>>, %arg4: memref<16x4xf32, #tpu.memory_space<vmem>>, %arg5: memref<16x4xf32, #tpu.memory_space<vmem>>) attributes {dimension_semantics = [#tpu.dimension_semantics<parallel>, #tpu.dimension_semantics<parallel>, #tpu.dimension_semantics<arbitrary>], iteration_bounds = array<i64: 2, 1, 1>, scalar_prefetch = 0 : i64, scratch_operands = 1 : i64, tpu.core_type = #tpu.core_type<tc>, window_params = [{transform_indices = @transform_0, window_bounds = array<i64: 16, 2, 4>}, {transform_indices = @transform_1, window_bounds = array<i64: 16, 4>}]} {
    %c0_i32 = arith.constant 0 : i32
    %0 = arith.cmpi eq, %arg2, %c0_i32 : i32
    %1 = arith.extui %0 : i1 to i32
    %c0_i32_0 = arith.constant 0 : i32
    %2 = arith.cmpi ne, %1, %c0_i32_0 : i32
    scf.if %2 {
      %cst_9 = arith.constant 0.000000e+00 : f32
      %12 = vector.broadcast %cst_9 : f32 to vector<16x4xf32>
      %c0_10 = arith.constant 0 : index
      %c0_11 = arith.constant 0 : index
      %13 = vector.load %arg5[%c0_10, %c0_11] : memref<16x4xf32, #tpu.memory_space<vmem>>, vector<16x4xf32>
      tpu.vector_store %arg5[%c0_10, %c0_11], %12 {strides = array<i32>} : memref<16x4xf32, #tpu.memory_space<vmem>>, vector<16x4xf32>,
    } else {
    }
    %c0 = arith.constant 0 : index
    %c0_1 = arith.constant 0 : index
    %c0_2 = arith.constant 0 : index
    %3 = vector.load %arg3[%c0, %c0_1, %c0_2] : memref<16x2x4xf32, #tpu.memory_space<vmem>>, vector<16x2x4xf32>
    %4 = arith.mulf %3, %3 : vector<16x2x4xf32>
    %c0_3 = arith.constant 0 : index
    %c0_4 = arith.constant 0 : index
    %5 = vector.load %arg5[%c0_3, %c0_4] : memref<16x4xf32, #tpu.memory_space<vmem>>, vector<16x4xf32>
    %cst = arith.constant dense<0.000000e+00> : vector<16x4xf32>
    %6 = vector.multi_reduction <add>, %4, %cst [1] : vector<16x2x4xf32> to vector<16x4xf32>
    %7 = arith.addf %5, %6 : vector<16x4xf32>
    %c0_5 = arith.constant 0 : index
    %c0_6 = arith.constant 0 : index
    %8 = vector.load %arg5[%c0_5, %c0_6] : memref<16x4xf32, #tpu.memory_space<vmem>>, vector<16x4xf32>
    tpu.vector_store %arg5[%c0_5, %c0_6], %7 {strides = array<i32>} : memref<16x4xf32, #tpu.memory_space<vmem>>, vector<16x4xf32>,
    %c0_i32_7 = arith.constant 0 : i32
    %9 = arith.cmpi eq, %arg2, %c0_i32_7 : i32
    %10 = arith.extui %9 : i1 to i32
    %c0_i32_8 = arith.constant 0 : i32
    %11 = arith.cmpi ne, %10, %c0_i32_8 : i32
    scf.if %11 {
      %c0_9 = arith.constant 0 : index
      %c0_10 = arith.constant 0 : index
      %12 = vector.load %arg5[%c0_9, %c0_10] : memref<16x4xf32, #tpu.memory_space<vmem>>, vector<16x4xf32>
      %c0_11 = arith.constant 0 : index
      %c0_12 = arith.constant 0 : index
      %13 = vector.load %arg4[%c0_11, %c0_12] : memref<16x4xf32, #tpu.memory_space<vmem>>, vector<16x4xf32>
      tpu.vector_store %arg4[%c0_11, %c0_12], %12 {strides = array<i32>} : memref<16x4xf32, #tpu.memory_space<vmem>>, vector<16x4xf32>,
    } else {
    }
    return
  }
  func.func @transform_0(%arg0: i32, %arg1: i32, %arg2: i32) -> (i32, i32, i32) {
    %c0_i32 = arith.constant 0 : i32
    return %arg0, %arg2, %arg1 : i32, i32, i32
  }
  func.func @transform_1(%arg0: i32, %arg1: i32, %arg2: i32) -> (i32, i32) {
    %c0_i32 = arith.constant 0 : i32
    return %arg0, %arg1 : i32, i32
  }
}

</mosaic_0001>

<bundles_post_ra>
// kernel: tpu_custom_call.1
= control target key start
LH: loop header
LB: loop body
LE: loop exit
PB: predicated region body
PF: predicated region fallthrough
CT: control target
= control target key end

     0   :  { %s529_s6 = smov 0   ;;  %s531_s7 = smov 0   ;;  %s637_s0 = inlined_call_operand.vmem [shape: f32[32,2,4], index: 0, kind: input, shape index: {}]   ;;  %s638_s1 = inlined_call_operand.vmem [shape: f32[32,4], index: 1, kind: output, shape index: {}]  }
   0x1   :  { %s533_s8 = smov 0  }
   0x2 LB: > { %s30_s9 = sadd.s32 1, %s512_s7  ;;  %p462_p0 = scmp.ge.s32.totalorder %s516_s8, 1  ;;  %s516_s8 = sphi %s533_s8, %s11_s8   ;;  %s512_s7 = sphi %s531_s7, %s641_s7   ;;  %s508_s6 = sphi %s529_s6, %s640_s6  }
   0x3   : > { %p32_p1 = scmp.ge.s32.totalorder %s30_s9, 2  ;;  %p119_p2 = scmp.lt.s32.totalorder %s516_s8, 3 }
   0x5   : > { %s643_s9 = smov (%p32_p1, %s30_s9), 0  ;;  %p120_p3 = pnand %p462_p0, %p119_p2 }
   0x6   : > { %s463_s10 = sshll.u32 (!%p120_p3), %s508_s6, 4  ;;  %s465_s15 = sshll.u32 (!%p120_p3), %s508_s6, 1 }
   0x7   : > { %123 = sbr.rel (%p120_p3) target bundleno = 68 (0x44), region = 24  ;;  %p149_p4 = scmp.lt.s32.totalorder (!%p120_p3), %s463_s10, 31 }
   0x8   : > { %p588_p5 = scmp.lt.s32.totalorder (!%p120_p3), %s465_s15, 3 }
   0xc   : > { %vm173_vm0 = vcmask 31744   ;;  %v518_v0 = vmov 0.0   ;;  %s645_s10 = smov (!%p149_p4, %s463_s10), 31  ;;  %vm210_vm1 = vcmask 25600   ;;  %vm339_vm2 = vcmask 1041409   ;;  %s647_s15 = smov (!%p588_p5, %s465_s15), 3 }
   0xd   : > { %174 = vst.msk [vmem:[#allocation2] sm:$0xff] %vm173_vm0, %v518_v0  ;;  %175 = vst.msk [vmem:[#allocation2 + $0x8] sm:$0xff] %vm173_vm0, %v518_v0  ;;  %s464_s11 = sshll.u32 %s645_s10, 1  ;;  %vm341_vm3 = vcmask 1042434   ;;  %vm343_vm4 = vcmask 1043459   ;;  %vm345_vm5 = vcmask 1044484  }
   0xe   : > { %s555_s14 = scalar_lea.vmem %s637_s0, %s464_s11  ;;  %vm347_vm6 = vcmask 1045509   ;;  %vm349_vm7 = vcmask 1046534   ;;  %vm351_vm8 = vcmask 1047559   ;;  %s466_s17 = sshll.u32 %s647_s15, 3 }
   0xf   : > { %v176_v1 = vld [vmem:[%s555_s14] sm:$0x3]  ;;  %v177_v2 = vld [vmem:[%s555_s14 + $0x2] sm:$0x3]  ;;  %v178_v3 = vld [vmem:[%s555_s14 + $0x4] sm:$0x3]  ;;  %s614_s20 = scalar_lea.vmem %s638_s1, %s466_s17 }
  0x10   : > { %v179_v4 = vld [vmem:[%s555_s14 + $0x6] sm:$0x3]  ;;  %v180_v5 = vld [vmem:[%s555_s14 + $0x8] sm:$0x3]  ;;  %v181_v6 = vld [vmem:[%s555_s14 + $0xa] sm:$0x3]  ;;  %v192_v7 = vmul.f32 %v176_v1, %v176_v1  ;;  %v193_v8 = vmul.f32 %v177_v2, %v177_v2  ;;  %v194_v9 = vmul.f32 %v178_v3, %v178_v3 }
  0x11   : > { %v182_v10 = vld [vmem:[%s555_s14 + $0xc] sm:$0x3]  ;;  %v183_v11 = vld [vmem:[%s555_s14 + $0xe] sm:$0x3]  ;;  %v195_v12 = vmul.f32 %v179_v4, %v179_v4  ;;  %v196_v13 = vmul.f32 %v180_v5, %v180_v5  ;;  %v197_v14 = vmul.f32 %v181_v6, %v181_v6  ;;  %v184_v59 = vld [vmem:[%s555_s14 + $0x10] sm:$0x3] }
  0x12   : > { %v198_v15 = vmul.f32 %v182_v10, %v182_v10  ;;  %v199_v16 = vmul.f32 %v183_v11, %v183_v11  ;;  %v211_v17 = vsel %vm210_vm1, %v192_v7, 0.0  ;;  %v218_v18 = vsel %vm210_vm1, %v193_v8, 0.0  ;;  %v185_v0 = vld [vmem:[%s555_s14 + $0x12] sm:$0x3]  ;;  %v186_v5 = vld [vmem:[%s555_s14 + $0x14] sm:$0x3] }
  0x13   : > { %v212_v19 = vrot.slane %v211_v17, 4  ;;  %v219_v20 = vrot.slane %v218_v18, 4  ;;  %v225_v21 = vsel %vm210_vm1, %v194_v9, 0.0  ;;  %v232_v22 = vsel %vm210_vm1, %v195_v12, 0.0  ;;  %v187_v6 = vld [vmem:[%s555_s14 + $0x16] sm:$0x3] }
  0x14   : > { %v226_v23 = vrot.slane %v225_v21, 4  ;;  %v233_v24 = vrot.slane %v232_v22, 4  ;;  %v239_v25 = vsel %vm210_vm1, %v196_v13, 0.0  ;;  %v246_v26 = vsel %vm210_vm1, %v197_v14, 0.0  ;;  %v188_v7 = vld [vmem:[%s555_s14 + $0x18] sm:$0x3] }
  0x15   : > { %v213_v27 = vadd.f32 %v212_v19, %v211_v17  ;;  %v220_v28 = vadd.f32 %v219_v20, %v218_v18  ;;  %v240_v29 = vrot.slane %v239_v25, 4  ;;  %v247_v30 = vrot.slane %v246_v26, 4  ;;  %v189_v11 = vld [vmem:[%s555_s14 + $0x1a] sm:$0x3]  ;;  %v191_v17 = vld [vmem:[%s555_s14 + $0x1e] sm:$0x3] }
  0x16   : > { %v227_v31 = vadd.f32 %v226_v23, %v225_v21  ;;  %v234_v32 = vadd.f32 %v233_v24, %v232_v22  ;;  %v253_v33 = vsel %vm210_vm1, %v198_v15, 0.0  ;;  %v260_v34 = vsel %vm210_vm1, %v199_v16, 0.0  ;;  %v190_v16 = vld [vmem:[%s555_s14 + $0x1c] sm:$0x3] }
  0x17   : > { %v214_v35 = vrot.slane %v213_v27, 2  ;;  %v221_v36 = vrot.slane %v220_v28, 2  ;;  %v241_v37 = vadd.f32 %v240_v29, %v239_v25  ;;  %v248_v38 = vadd.f32 %v247_v30, %v246_v26 }
  0x18   : > { %v228_v39 = vrot.slane %v227_v31, 2  ;;  %v235_v40 = vrot.slane %v234_v32, 2  ;;  %v254_v41 = vrot.slane %v253_v33, 4  ;;  %v261_v42 = vrot.slane %v260_v34, 4 }
  0x19   : > { %v215_v43 = vadd.f32 %v214_v35, %v213_v27  ;;  %v222_v44 = vadd.f32 %v221_v36, %v220_v28  ;;  %v242_v45 = vrot.slane %v241_v37, 2  ;;  %v249_v46 = vrot.slane %v248_v38, 2  ;;  %v208_v27 = vld [vmem:[#allocation2] sm:$0xff] }
  0x1a   : > { %v229_v47 = vadd.f32 %v228_v39, %v227_v31  ;;  %v236_v48 = vadd.f32 %v235_v40, %v234_v32  ;;  %v255_v49 = vadd.f32 %v254_v41, %v253_v33  ;;  %v262_v50 = vadd.f32 %v261_v42, %v260_v34 }
  0x1b   : > { %v216_v51 = vrot.slane %v215_v43, 1  ;;  %v223_v52 = vrot.slane %v222_v44, 1  ;;  %v243_v53 = vadd.f32 %v242_v45, %v241_v37  ;;  %v250_v54 = vadd.f32 %v249_v46, %v248_v38 }
  0x1c   : > { %v230_v55 = vrot.slane %v229_v47, 1  ;;  %v237_v56 = vrot.slane %v236_v48, 1  ;;  %v256_v57 = vrot.slane %v255_v49, 2  ;;  %v263_v58 = vrot.slane %v262_v50, 2 }
  0x1d   : > { %v217_v60 = vadd.f32 %v216_v51, %v215_v43  ;;  %v224_v61 = vadd.f32 %v223_v52, %v222_v44  ;;  %v244_v62 = vrot.slane %v243_v53, 1  ;;  %v251_v63 = vrot.slane %v250_v54, 1 }
  0x1e   : > { %v231_v1 = vadd.f32 %v230_v55, %v229_v47  ;;  %v238_v2 = vadd.f32 %v237_v56, %v236_v48  ;;  %v257_v3 = vadd.f32 %v256_v57, %v255_v49  ;;  %v264_v4 = vadd.f32 %v263_v58, %v262_v50 }
  0x1f   : > { %v245_v8 = vadd.f32 %v244_v62, %v243_v53  ;;  %v252_v9 = vadd.f32 %v251_v63, %v250_v54  ;;  %v340_v10 = vsel %vm339_vm2, %v224_v61, %v217_v60  ;;  %v200_v12 = vmul.f32 %v184_v59, %v184_v59 }
  0x20   : > { %v258_v13 = vrot.slane %v257_v3, 1  ;;  %v265_v14 = vrot.slane %v264_v4, 1  ;;  %v342_v15 = vsel %vm341_vm3, %v231_v1, %v340_v10  ;;  %v201_v18 = vmul.f32 %v185_v0, %v185_v0 }
  0x21   : > { %v344_v19 = vsel %vm343_vm4, %v238_v2, %v342_v15  ;;  %v202_v20 = vmul.f32 %v186_v5, %v186_v5  ;;  %v203_v21 = vmul.f32 %v187_v6, %v187_v6  ;;  %v204_v22 = vmul.f32 %v188_v7, %v188_v7 }
  0x22   : > { %v259_v23 = vadd.f32 %v258_v13, %v257_v3  ;;  %v266_v24 = vadd.f32 %v265_v14, %v264_v4  ;;  %v346_v25 = vsel %vm345_vm5, %v245_v8, %v344_v19  ;;  %v205_v26 = vmul.f32 %v189_v11, %v189_v11 }
  0x23   : > { %v348_v28 = vsel %vm347_vm6, %v252_v9, %v346_v25  ;;  %v206_v29 = vmul.f32 %v190_v16, %v190_v16  ;;  %v207_v30 = vmul.f32 %v191_v17, %v191_v17  ;;  %v267_v31 = vsel %vm210_vm1, %v200_v12, 0.0 }
  0x24   : > { %v350_v32 = vsel %vm349_vm7, %v259_v23, %v348_v28  ;;  %v268_v33 = vrot.slane %v267_v31, 4  ;;  %v274_v34 = vsel %vm210_vm1, %v201_v18, 0.0  ;;  %v281_v35 = vsel %vm210_vm1, %v202_v20, 0.0 }
  0x25   : > { %v352_v36 = vsel %vm351_vm8, %v266_v24, %v350_v32  ;;  %v275_v37 = vrot.slane %v274_v34, 4  ;;  %v282_v38 = vrot.slane %v281_v35, 4  ;;  %v288_v39 = vsel %vm210_vm1, %v203_v21, 0.0 }
  0x26   : > { %v362_v40 = vadd.f32 %v352_v36, %v208_v27  ;;  %v269_v41 = vadd.f32 %v268_v33, %v267_v31  ;;  %v289_v42 = vrot.slane %v288_v39, 4  ;;  %v295_v43 = vsel %vm210_vm1, %v204_v22, 0.0  ;;  %v209_v31 = vld [vmem:[#allocation2 + $0x8] sm:$0xff] }
  0x27   : > { %v276_v44 = vadd.f32 %v275_v37, %v274_v34  ;;  %v283_v45 = vadd.f32 %v282_v38, %v281_v35  ;;  %v296_v46 = vrot.slane %v295_v43, 4  ;;  %v302_v47 = vsel %vm210_vm1, %v205_v26, 0.0 }
  0x28   : > { %365 = vst.msk [vmem:[#allocation2] sm:$0xff] %vm173_vm0, %v362_v40  ;;  %v270_v48 = vrot.slane %v269_v41, 2  ;;  %v290_v49 = vadd.f32 %v289_v42, %v288_v39  ;;  %v303_v50 = vrot.slane %v302_v47, 4  ;;  %v309_v51 = vsel %vm210_vm1, %v206_v29, 0.0 }
  0x29   : > { %v277_v52 = vrot.slane %v276_v44, 2  ;;  %v284_v53 = vrot.slane %v283_v45, 2  ;;  %v297_v54 = vadd.f32 %v296_v46, %v295_v43  ;;  %v310_v55 = vrot.slane %v309_v51, 4 }
  0x2a   : > { %v271_v56 = vadd.f32 %v270_v48, %v269_v41  ;;  %v291_v57 = vrot.slane %v290_v49, 2  ;;  %v304_v58 = vadd.f32 %v303_v50, %v302_v47  ;;  %v316_v59 = vsel %vm210_vm1, %v207_v30, 0.0 }
  0x2b   : > { %v278_v60 = vadd.f32 %v277_v52, %v276_v44  ;;  %v285_v61 = vadd.f32 %v284_v53, %v283_v45  ;;  %v298_v62 = vrot.slane %v297_v54, 2  ;;  %v311_v63 = vadd.f32 %v310_v55, %v309_v51 }
  0x2c   : > { %v272_v0 = vrot.slane %v271_v56, 1  ;;  %v292_v1 = vadd.f32 %v291_v57, %v290_v49  ;;  %v305_v2 = vrot.slane %v304_v58, 2  ;;  %v317_v3 = vrot.slane %v316_v59, 4 }
  0x2d   : > { %v279_v4 = vrot.slane %v278_v60, 1  ;;  %v286_v5 = vrot.slane %v285_v61, 1  ;;  %v299_v6 = vadd.f32 %v298_v62, %v297_v54  ;;  %v312_v7 = vrot.slane %v311_v63, 2 }
  0x2e   : > { %v273_v8 = vadd.f32 %v272_v0, %v271_v56  ;;  %v293_v9 = vrot.slane %v292_v1, 1  ;;  %v306_v10 = vadd.f32 %v305_v2, %v304_v58  ;;  %v318_v11 = vadd.f32 %v317_v3, %v316_v59 }
  0x2f   : > { %v280_v12 = vadd.f32 %v279_v4, %v278_v60  ;;  %v287_v13 = vadd.f32 %v286_v5, %v285_v61  ;;  %v300_v14 = vrot.slane %v299_v6, 1  ;;  %v313_v15 = vadd.f32 %v312_v7, %v311_v63  ;;  %v370_v16 = vld [vmem:[#allocation2] sm:$0xff] }
  0x30   : > { %v294_v17 = vadd.f32 %v293_v9, %v292_v1  ;;  %v307_v18 = vrot.slane %v306_v10, 1  ;;  %v319_v19 = vrot.slane %v318_v11, 2  ;;  %372 = vst.msk [vmem:[%s614_s20] sm:$0xff] %vm173_vm0, %v370_v16 }
  0x31   : > { %v301_v20 = vadd.f32 %v300_v14, %v299_v6  ;;  %v314_v21 = vrot.slane %v313_v15, 1  ;;  %v353_v22 = vsel %vm339_vm2, %v280_v12, %v273_v8 }
  0x32   : > { %v308_v23 = vadd.f32 %v307_v18, %v306_v10  ;;  %v320_v24 = vadd.f32 %v319_v19, %v318_v11  ;;  %v354_v25 = vsel %vm341_vm3, %v287_v13, %v353_v22 }
  0x33   : > { %v315_v26 = vadd.f32 %v314_v21, %v313_v15  ;;  %v355_v27 = vsel %vm343_vm4, %v294_v17, %v354_v25 }
  0x34   : > { %v321_v28 = vrot.slane %v320_v24, 1  ;;  %v356_v29 = vsel %vm345_vm5, %v301_v20, %v355_v27 }
  0x35   : > { %v357_v30 = vsel %vm347_vm6, %v308_v23, %v356_v29 }
  0x36   : > { %v322_v32 = vadd.f32 %v321_v28, %v320_v24  ;;  %v358_v33 = vsel %vm349_vm7, %v315_v26, %v357_v30 }
  0x38   : > { %v359_v34 = vsel %vm351_vm8, %v322_v32, %v358_v33 }
  0x39   : > { %v363_v35 = vadd.f32 %v359_v34, %v209_v31 }
  0x3b   : > { %366 = vst.msk [vmem:[#allocation2 + $0x8] sm:$0xff] %vm173_vm0, %v363_v35 }
  0x42   : > { %v371_v36 = vld [vmem:[#allocation2 + $0x8] sm:$0xff] }
  0x43   : > { %373 = vst.msk [vmem:[%s614_s20 + $0x8] sm:$0xff] %vm173_vm0, %v371_v36 }
  0x44 PF: > { %s11_s8 = sadd.s32 1, %s516_s8   ;;  %s640_s6 = smov %s512_s7 }
  0x45   : > { %p8_p6 = scmp.ge.s32.totalorder %s11_s8, 4   ;;  %s641_s7 = smov %s643_s9 }
  0x47   :  { %10 = sbr.rel (!%p8_p6) target bundleno = 2 (0x2), region = 62 }

</bundles_post_ra>
